<compile_context>
chip_gen: v6e
topology: v6e:2x2x1
jax: 0.10.0
libtpu: 0.0.40
codegen_flags: <defaults>
</compile_context>

<pallas_src>
import jax
import jax.numpy as jnp
from jax import lax
from jax.experimental import pallas as pl
from jax.experimental.pallas import tpu as pltpu


def _mlp_kernel(x_ref,
                w1_ref, b1_ref, w2_ref, b2_ref, w3_ref, b3_ref,
                w4_ref, b4_ref, w5_ref, b5_ref, w6_ref, b6_ref,
                o_ref):
    """Fused forward for one batch tile.

    x_ref : [tile_b, nsv_dim]   (batch-major, straight from the user array)
    w*_ref: [out, in]  bf16 (PyTorch nn.Linear layout, pre-cast in wrapper)
    b*_ref: [out, 1]   f32
    o_ref : [nsv_dim, tile_b]   (feature-major -> lane-dense stores)
    """
    x = x_ref[...].astype(jnp.bfloat16)                       # [tile, D]

    # Layer 1: contract the feature axis of both W1 [32, D] and x [tile, D]
    # -> [32, tile].  Keeps everything feature-major with no wrapper transpose.
    y = lax.dot_general(
        w1_ref[...], x,
        dimension_numbers=(((1,), (1,)), ((), ())),
        preferred_element_type=jnp.float32)                   # [32, tile]
    h = jnp.maximum(y + b1_ref[...], 0.0).astype(jnp.bfloat16)

    def layer(h, w_ref, b_ref, relu):
        # bf16 MXU inputs, f32 accumulate; bias-add / ReLU stay f32.
        y = jnp.dot(w_ref[...], h, preferred_element_type=jnp.float32)  # [out, tile]
        y = y + b_ref[...]                                     # [out, 1] broadcast
        if relu:
            # bf16 inter-layer activations: halves spill traffic, next matmul
            # needs bf16 anyway.
            return jnp.maximum(y, 0.0).astype(jnp.bfloat16)
        return y                                               # final layer stays f32

    h = layer(h, w2_ref, b2_ref, True)
    h = layer(h, w3_ref, b3_ref, True)
    h = layer(h, w4_ref, b4_ref, True)
    h = layer(h, w5_ref, b5_ref, True)
    y = layer(h, w6_ref, b6_ref, False)                        # [D, tile], no ReLU
    o_ref[...] = y.astype(o_ref.dtype)


def nsv_mlp_forward(x, params, *, tile_b=4096):
    """x: [B, nsv_dim] float32 (PyTorch layout).
    params: list of 6 (W [out, in], b [out, 1]) pairs (PyTorch layout, f32).
    Returns [B, nsv_dim]."""
    B, D = x.shape

    # Lane-aligned batch extent and tile selection.
    b128 = pl.cdiv(B, 128) * 128
    tile = max(128, (min(tile_b, b128) // 128) * 128)
    if b128 >= 256:
        # Keep at least 2 grid steps so both v7x TensorCores get work
        # (costs one ~0.35us grid step on single-core v5e/v6e -> negligible).
        tile = min(tile, max(128, (b128 // 256) * 128))
    grid_n = pl.cdiv(B, tile)
    b_pad = grid_n * tile

    # Cheap pad (no transpose, no zeros+set); skipped when B already divides.
    x_p = x if b_pad == B else jnp.pad(x, ((0, b_pad - B), (0, 0)))

    flat_params = []
    in_specs = [pl.BlockSpec((tile, D), lambda i: (i, 0))]     # x, tiled over batch
    for (w, b) in params:
        flat_params.append(w.astype(jnp.bfloat16))             # pre-cast: half DMA bytes
        flat_params.append(b.astype(jnp.float32))
        in_specs.append(pl.BlockSpec(w.shape, lambda i: (0, 0)))   # weights VMEM-resident
        in_specs.append(pl.BlockSpec(b.shape, lambda i: (0, 0)))

    out_spec = pl.BlockSpec((D, tile), lambda i: (0, i))        # feature-major output

    out_t = pl.pallas_call(
        _mlp_kernel,
        out_shape=jax.ShapeDtypeStruct((D, b_pad), x.dtype),
        grid_spec=pltpu.PrefetchScalarGridSpec(
            num_scalar_prefetch=0,
            grid=(grid_n,),
            in_specs=in_specs,
            out_specs=out_spec,
        ),
        compiler_params=pltpu.CompilerParams(
            dimension_semantics=("parallel",)),
    )(x_p, *flat_params)

    # Single cheap untranspose back to the module's [B, D] contract.
    return out_t[:, :B].T


def init_params(nsv_dim, key):
    """PyTorch nn.Linear-style init: uniform(-1/sqrt(fan_in), 1/sqrt(fan_in)).
    Weights stored [out, in], biases [out, 1]."""
    dims = [nsv_dim, 32, 64, 128, 64, 32, nsv_dim]
    params = []
    keys = jax.random.split(key, len(dims) - 1)
    for k, d_in, d_out in zip(keys, dims[:-1], dims[1:]):
        kw, kb = jax.random.split(k)
        bound = 1.0 / jnp.sqrt(float(d_in))
        w = jax.random.uniform(kw, (d_out, d_in), jnp.float32, -bound, bound)
        b = jax.random.uniform(kb, (d_out, 1), jnp.float32, -bound, bound)
        params.append((w, b))
    return params


def reference_forward(x, params):
    h = x
    for i, (w, b) in enumerate(params):
        h = h @ w.T + b[:, 0]
        if i < len(params) - 1:
            h = jnp.maximum(h, 0.0)
    return h


if __name__ == "__main__":
    nsv_dim = 8
    key = jax.random.PRNGKey(0)
    k1, k2, kp = jax.random.split(key, 3)
    params = init_params(nsv_dim, kp)

    # Small case (module-scale shapes): batch=16 -> one 128-wide tile.
    x_small = jax.random.normal(k1, (16, nsv_dim), jnp.float32)
    out_small = jax.block_until_ready(nsv_mlp_forward(x_small, params))
    ref_small = reference_forward(x_small, params)
    assert out_small.shape == x_small.shape
    # bf16 MXU inputs (f32 accumulate) -> slightly looser tolerance than pure f32.
    assert jnp.allclose(out_small, ref_small, atol=3e-2, rtol=3e-2), "mismatch (small)"

    # Non-multiple batch: exercises cdiv gridding + padding and a multi-step grid
    # (tile capped to keep >= 2 steps).
    x_big = jax.random.normal(k2, (1000, nsv_dim), jnp.float32)
    out_big = jax.block_until_ready(nsv_mlp_forward(x_big, params))
    ref_big = reference_forward(x_big, params)
    assert out_big.shape == x_big.shape
    assert jnp.allclose(out_big, ref_big, atol=3e-2, rtol=3e-2), "mismatch (big)"

    print("KERNEL_OK")
</pallas_src>

<mosaic_0001>
module attributes {stable_mosaic.version = 11 : i64} {
  func.func @_mlp_kernel(%arg0: i32, %arg1: memref<128x8xf32, #tpu.memory_space<vmem>>, %arg2: memref<32x8xbf16, #tpu.memory_space<vmem>>, %arg3: memref<32x1xf32, #tpu.memory_space<vmem>>, %arg4: memref<64x32xbf16, #tpu.memory_space<vmem>>, %arg5: memref<64x1xf32, #tpu.memory_space<vmem>>, %arg6: memref<128x64xbf16, #tpu.memory_space<vmem>>, %arg7: memref<128x1xf32, #tpu.memory_space<vmem>>, %arg8: memref<64x128xbf16, #tpu.memory_space<vmem>>, %arg9: memref<64x1xf32, #tpu.memory_space<vmem>>, %arg10: memref<32x64xbf16, #tpu.memory_space<vmem>>, %arg11: memref<32x1xf32, #tpu.memory_space<vmem>>, %arg12: memref<8x32xbf16, #tpu.memory_space<vmem>>, %arg13: memref<8x1xf32, #tpu.memory_space<vmem>>, %arg14: memref<8x128xf32, #tpu.memory_space<vmem>>) attributes {dimension_semantics = [#tpu.dimension_semantics<parallel>], iteration_bounds = array<i64: 1>, scalar_prefetch = 0 : i64, scratch_operands = 0 : i64, tpu.core_type = #tpu.core_type<tc>, window_params = [{transform_indices = @transform_0, window_bounds = array<i64: 128, 8>}, {pipeline_mode = #tpu.pipeline_mode<synchronous>, transform_indices = @transform_1, window_bounds = array<i64: 32, 8>}, {pipeline_mode = #tpu.pipeline_mode<synchronous>, transform_indices = @transform_2, window_bounds = array<i64: 32, 1>}, {pipeline_mode = #tpu.pipeline_mode<synchronous>, transform_indices = @transform_3, window_bounds = array<i64: 64, 32>}, {pipeline_mode = #tpu.pipeline_mode<synchronous>, transform_indices = @transform_4, window_bounds = array<i64: 64, 1>}, {pipeline_mode = #tpu.pipeline_mode<synchronous>, transform_indices = @transform_5, window_bounds = array<i64: 128, 64>}, {pipeline_mode = #tpu.pipeline_mode<synchronous>, transform_indices = @transform_6, window_bounds = array<i64: 128, 1>}, {pipeline_mode = #tpu.pipeline_mode<synchronous>, transform_indices = @transform_7, window_bounds = array<i64: 64, 128>}, {pipeline_mode = #tpu.pipeline_mode<synchronous>, transform_indices = @transform_8, window_bounds = array<i64: 64, 1>}, {pipeline_mode = #tpu.pipeline_mode<synchronous>, transform_indices = @transform_9, window_bounds = array<i64: 32, 64>}, {pipeline_mode = #tpu.pipeline_mode<synchronous>, transform_indices = @transform_10, window_bounds = array<i64: 32, 1>}, {pipeline_mode = #tpu.pipeline_mode<synchronous>, transform_indices = @transform_11, window_bounds = array<i64: 8, 32>}, {pipeline_mode = #tpu.pipeline_mode<synchronous>, transform_indices = @transform_12, window_bounds = array<i64: 8, 1>}, {transform_indices = @transform_13, window_bounds = array<i64: 8, 128>}]} {
    %c0 = arith.constant 0 : index
    %c0_0 = arith.constant 0 : index
    %0 = vector.load %arg1[%c0, %c0_0] : memref<128x8xf32, #tpu.memory_space<vmem>>, vector<128x8xf32>
    %1 = arith.truncf %0 : vector<128x8xf32> to vector<128x8xbf16>
    %c0_1 = arith.constant 0 : index
    %c0_2 = arith.constant 0 : index
    %2 = vector.load %arg2[%c0_1, %c0_2] : memref<32x8xbf16, #tpu.memory_space<vmem>>, vector<32x8xbf16>
    %cst = arith.constant dense<0.000000e+00> : vector<32x128xf32>
    %3 = tpu.matmul %2, %1, %cst {dimension_numbers = #tpu.dot_dimension_numbers<[1], [1], [0], [0], [0, 0, 1, 0], [], []>} : vector<32x8xbf16>, vector<128x8xbf16>, vector<32x128xf32> -> vector<32x128xf32>
    %c0_3 = arith.constant 0 : index
    %c0_4 = arith.constant 0 : index
    %4 = vector.load %arg3[%c0_3, %c0_4] : memref<32x1xf32, #tpu.memory_space<vmem>>, vector<32x1xf32>
    %5 = vector.broadcast %4 : vector<32x1xf32> to vector<32x128xf32>
    %6 = arith.addf %3, %5 : vector<32x128xf32>
    %cst_5 = arith.constant 0.000000e+00 : f32
    %7 = vector.broadcast %cst_5 : f32 to vector<32x128xf32>
    %8 = arith.maximumf %6, %7 : vector<32x128xf32>
    %9 = arith.truncf %8 : vector<32x128xf32> to vector<32x128xbf16>
    %c0_6 = arith.constant 0 : index
    %c0_7 = arith.constant 0 : index
    %10 = vector.load %arg4[%c0_6, %c0_7] : memref<64x32xbf16, #tpu.memory_space<vmem>>, vector<64x32xbf16>
    %cst_8 = arith.constant dense<0.000000e+00> : vector<64x128xf32>
    %11 = tpu.matmul %10, %9, %cst_8 {dimension_numbers = #tpu.dot_dimension_numbers<[1], [0], [0], [1], [0, 0, 1, 1], [], []>} : vector<64x32xbf16>, vector<32x128xbf16>, vector<64x128xf32> -> vector<64x128xf32>
    %c0_9 = arith.constant 0 : index
    %c0_10 = arith.constant 0 : index
    %12 = vector.load %arg5[%c0_9, %c0_10] : memref<64x1xf32, #tpu.memory_space<vmem>>, vector<64x1xf32>
    %13 = vector.broadcast %12 : vector<64x1xf32> to vector<64x128xf32>
    %14 = arith.addf %11, %13 : vector<64x128xf32>
    %cst_11 = arith.constant 0.000000e+00 : f32
    %15 = vector.broadcast %cst_11 : f32 to vector<64x128xf32>
    %16 = arith.maximumf %14, %15 : vector<64x128xf32>
    %17 = arith.truncf %16 : vector<64x128xf32> to vector<64x128xbf16>
    %c0_12 = arith.constant 0 : index
    %c0_13 = arith.constant 0 : index
    %18 = vector.load %arg6[%c0_12, %c0_13] : memref<128x64xbf16, #tpu.memory_space<vmem>>, vector<128x64xbf16>
    %cst_14 = arith.constant dense<0.000000e+00> : vector<128x128xf32>
    %19 = tpu.matmul %18, %17, %cst_14 {dimension_numbers = #tpu.dot_dimension_numbers<[1], [0], [0], [1], [0, 0, 1, 1], [], []>} : vector<128x64xbf16>, vector<64x128xbf16>, vector<128x128xf32> -> vector<128x128xf32>
    %c0_15 = arith.constant 0 : index
    %c0_16 = arith.constant 0 : index
    %20 = vector.load %arg7[%c0_15, %c0_16] : memref<128x1xf32, #tpu.memory_space<vmem>>, vector<128x1xf32>
    %21 = vector.broadcast %20 : vector<128x1xf32> to vector<128x128xf32>
    %22 = arith.addf %19, %21 : vector<128x128xf32>
    %cst_17 = arith.constant 0.000000e+00 : f32
    %23 = vector.broadcast %cst_17 : f32 to vector<128x128xf32>
    %24 = arith.maximumf %22, %23 : vector<128x128xf32>
    %25 = arith.truncf %24 : vector<128x128xf32> to vector<128x128xbf16>
    %c0_18 = arith.constant 0 : index
    %c0_19 = arith.constant 0 : index
    %26 = vector.load %arg8[%c0_18, %c0_19] : memref<64x128xbf16, #tpu.memory_space<vmem>>, vector<64x128xbf16>
    %cst_20 = arith.constant dense<0.000000e+00> : vector<64x128xf32>
    %27 = tpu.matmul %26, %25, %cst_20 {dimension_numbers = #tpu.dot_dimension_numbers<[1], [0], [0], [1], [0, 0, 1, 1], [], []>} : vector<64x128xbf16>, vector<128x128xbf16>, vector<64x128xf32> -> vector<64x128xf32>
    %c0_21 = arith.constant 0 : index
    %c0_22 = arith.constant 0 : index
    %28 = vector.load %arg9[%c0_21, %c0_22] : memref<64x1xf32, #tpu.memory_space<vmem>>, vector<64x1xf32>
    %29 = vector.broadcast %28 : vector<64x1xf32> to vector<64x128xf32>
    %30 = arith.addf %27, %29 : vector<64x128xf32>
    %cst_23 = arith.constant 0.000000e+00 : f32
    %31 = vector.broadcast %cst_23 : f32 to vector<64x128xf32>
    %32 = arith.maximumf %30, %31 : vector<64x128xf32>
    %33 = arith.truncf %32 : vector<64x128xf32> to vector<64x128xbf16>
    %c0_24 = arith.constant 0 : index
    %c0_25 = arith.constant 0 : index
    %34 = vector.load %arg10[%c0_24, %c0_25] : memref<32x64xbf16, #tpu.memory_space<vmem>>, vector<32x64xbf16>
    %cst_26 = arith.constant dense<0.000000e+00> : vector<32x128xf32>
    %35 = tpu.matmul %34, %33, %cst_26 {dimension_numbers = #tpu.dot_dimension_numbers<[1], [0], [0], [1], [0, 0, 1, 1], [], []>} : vector<32x64xbf16>, vector<64x128xbf16>, vector<32x128xf32> -> vector<32x128xf32>
    %c0_27 = arith.constant 0 : index
    %c0_28 = arith.constant 0 : index
    %36 = vector.load %arg11[%c0_27, %c0_28] : memref<32x1xf32, #tpu.memory_space<vmem>>, vector<32x1xf32>
    %37 = vector.broadcast %36 : vector<32x1xf32> to vector<32x128xf32>
    %38 = arith.addf %35, %37 : vector<32x128xf32>
    %cst_29 = arith.constant 0.000000e+00 : f32
    %39 = vector.broadcast %cst_29 : f32 to vector<32x128xf32>
    %40 = arith.maximumf %38, %39 : vector<32x128xf32>
    %41 = arith.truncf %40 : vector<32x128xf32> to vector<32x128xbf16>
    %c0_30 = arith.constant 0 : index
    %c0_31 = arith.constant 0 : index
    %42 = vector.load %arg12[%c0_30, %c0_31] : memref<8x32xbf16, #tpu.memory_space<vmem>>, vector<8x32xbf16>
    %cst_32 = arith.constant dense<0.000000e+00> : vector<8x128xf32>
    %43 = tpu.matmul %42, %41, %cst_32 {dimension_numbers = #tpu.dot_dimension_numbers<[1], [0], [0], [1], [0, 0, 1, 1], [], []>} : vector<8x32xbf16>, vector<32x128xbf16>, vector<8x128xf32> -> vector<8x128xf32>
    %c0_33 = arith.constant 0 : index
    %c0_34 = arith.constant 0 : index
    %44 = vector.load %arg13[%c0_33, %c0_34] : memref<8x1xf32, #tpu.memory_space<vmem>>, vector<8x1xf32>
    %45 = vector.broadcast %44 : vector<8x1xf32> to vector<8x128xf32>
    %46 = arith.addf %43, %45 : vector<8x128xf32>
    %c0_35 = arith.constant 0 : index
    %c0_36 = arith.constant 0 : index
    %47 = vector.load %arg14[%c0_35, %c0_36] : memref<8x128xf32, #tpu.memory_space<vmem>>, vector<8x128xf32>
    tpu.vector_store %arg14[%c0_35, %c0_36], %46 {strides = array<i32>} : memref<8x128xf32, #tpu.memory_space<vmem>>, vector<8x128xf32>,
    return
  }
  func.func @transform_0(%arg0: i32) -> (i32, i32) {
    %c0_i32 = arith.constant 0 : i32
    %c0_i32_0 = arith.constant 0 : i32
    return %arg0, %c0_i32 : i32, i32
  }
  func.func @transform_1(%arg0: i32) -> (i32, i32) {
    %c0_i32 = arith.constant 0 : i32
    %c0_i32_0 = arith.constant 0 : i32
    %c0_i32_1 = arith.constant 0 : i32
    return %c0_i32, %c0_i32_0 : i32, i32
  }
  func.func @transform_2(%arg0: i32) -> (i32, i32) {
    %c0_i32 = arith.constant 0 : i32
    %c0_i32_0 = arith.constant 0 : i32
    %c0_i32_1 = arith.constant 0 : i32
    return %c0_i32, %c0_i32_0 : i32, i32
  }
  func.func @transform_3(%arg0: i32) -> (i32, i32) {
    %c0_i32 = arith.constant 0 : i32
    %c0_i32_0 = arith.constant 0 : i32
    %c0_i32_1 = arith.constant 0 : i32
    return %c0_i32, %c0_i32_0 : i32, i32
  }
  func.func @transform_4(%arg0: i32) -> (i32, i32) {
    %c0_i32 = arith.constant 0 : i32
    %c0_i32_0 = arith.constant 0 : i32
    %c0_i32_1 = arith.constant 0 : i32
    return %c0_i32, %c0_i32_0 : i32, i32
  }
  func.func @transform_5(%arg0: i32) -> (i32, i32) {
    %c0_i32 = arith.constant 0 : i32
    %c0_i32_0 = arith.constant 0 : i32
    %c0_i32_1 = arith.constant 0 : i32
    return %c0_i32, %c0_i32_0 : i32, i32
  }
  func.func @transform_6(%arg0: i32) -> (i32, i32) {
    %c0_i32 = arith.constant 0 : i32
    %c0_i32_0 = arith.constant 0 : i32
    %c0_i32_1 = arith.constant 0 : i32
    return %c0_i32, %c0_i32_0 : i32, i32
  }
  func.func @transform_7(%arg0: i32) -> (i32, i32) {
    %c0_i32 = arith.constant 0 : i32
    %c0_i32_0 = arith.constant 0 : i32
    %c0_i32_1 = arith.constant 0 : i32
    return %c0_i32, %c0_i32_0 : i32, i32
  }
  func.func @transform_8(%arg0: i32) -> (i32, i32) {
    %c0_i32 = arith.constant 0 : i32
    %c0_i32_0 = arith.constant 0 : i32
    %c0_i32_1 = arith.constant 0 : i32
    return %c0_i32, %c0_i32_0 : i32, i32
  }
  func.func @transform_9(%arg0: i32) -> (i32, i32) {
    %c0_i32 = arith.constant 0 : i32
    %c0_i32_0 = arith.constant 0 : i32
    %c0_i32_1 = arith.constant 0 : i32
    return %c0_i32, %c0_i32_0 : i32, i32
  }
  func.func @transform_10(%arg0: i32) -> (i32, i32) {
    %c0_i32 = arith.constant 0 : i32
    %c0_i32_0 = arith.constant 0 : i32
    %c0_i32_1 = arith.constant 0 : i32
    return %c0_i32, %c0_i32_0 : i32, i32
  }
  func.func @transform_11(%arg0: i32) -> (i32, i32) {
    %c0_i32 = arith.constant 0 : i32
    %c0_i32_0 = arith.constant 0 : i32
    %c0_i32_1 = arith.constant 0 : i32
    return %c0_i32, %c0_i32_0 : i32, i32
  }
  func.func @transform_12(%arg0: i32) -> (i32, i32) {
    %c0_i32 = arith.constant 0 : i32
    %c0_i32_0 = arith.constant 0 : i32
    %c0_i32_1 = arith.constant 0 : i32
    return %c0_i32, %c0_i32_0 : i32, i32
  }
  func.func @transform_13(%arg0: i32) -> (i32, i32) {
    %c0_i32 = arith.constant 0 : i32
    %c0_i32_0 = arith.constant 0 : i32
    return %c0_i32, %arg0 : i32, i32
  }
}

</mosaic_0001>

<bundles_post_ra>
// kernel: tpu_custom_call.1
= control target key start
LH: loop header
LB: loop body
LE: loop exit
PB: predicated region body
PF: predicated region fallthrough
CT: control target
= control target key end

     0   :  { %vm108_vm0 = vcmask 64512   ;;  %v1221_v5 = vmov 0   ;;  %s1574_s0 = inlined_call_operand.vmem [shape: f32[128,8], index: 0, kind: input, shape index: {}]   ;;  %s1575_s1 = inlined_call_operand.vmem [shape: bf16[32,8], index: 1, kind: input, shape index: {}]   ;;  %s1576_s2 = inlined_call_operand.vmem [shape: f32[32,1], index: 2, kind: input, shape index: {}]   ;;  %s1577_s3 = inlined_call_operand.vmem [shape: bf16[64,32], index: 3, kind: input, shape index: {}]   ;;  %s1578_s4 = inlined_call_operand.vmem [shape: f32[64,1], index: 4, kind: input, shape index: {}]   ;;  %s1579_s5 = inlined_call_operand.vmem [shape: bf16[128,64], index: 5, kind: input, shape index: {}]   ;;  %s1580_s6 = inlined_call_operand.vmem [shape: f32[128,1], index: 6, kind: input, shape index: {}]   ;;  %s1581_s7 = inlined_call_operand.vmem [shape: bf16[64,128], index: 7, kind: input, shape index: {}]   ;;  %s1582_s8 = inlined_call_operand.vmem [shape: f32[64,1], index: 8, kind: input, shape index: {}]   ;;  %s1583_s9 = inlined_call_operand.vmem [shape: bf16[32,64], index: 9, kind: input, shape index: {}]   ;;  %s1584_s10 = inlined_call_operand.vmem [shape: f32[32,1], index: 10, kind: input, shape index: {}]   ;;  %s1585_s11 = inlined_call_operand.vmem [shape: bf16[8,32], index: 11, kind: input, shape index: {}]   ;;  %s1586_s12 = inlined_call_operand.vmem [shape: f32[8,1], index: 12, kind: input, shape index: {}]   ;;  %s1587_s13 = inlined_call_operand.hbm [shape: f32[8,128], index: 13, kind: output, shape index: {}]  }
   0x1   :  { %v60_v0 = vld [vmem:[%s1574_s0 + $0x70] sm:$0xff]  ;;  %v61_v1 = vld [vmem:[%s1574_s0 + $0x78] sm:$0xff]  ;;  %v58_v2 = vld [vmem:[%s1574_s0 + $0x60] sm:$0xff]  ;;  %1177 = vset.pattern.permute.xlu0 %v1221_v5  ;;  %1178 = vset.pattern.permute.xlu1 %v1221_v5 }
   0x2   :  { %v69_v3 = vpack.c.bf16 %v61_v1, %v60_v0  ;;  %v59_v4 = vld [vmem:[%s1574_s0 + $0x68] sm:$0xff]  ;;  %v76_v8 = vld [vmem:[%s1576_s2 + $0x10] sm:$0xff]  ;;  %v57_v10 = vld [vmem:[%s1574_s0 + $0x58] sm:$0xff] }
   0x3   :  { %v68_v6 = vpack.c.bf16 %v59_v4, %v58_v2  ;;  %v56_v9 = vld [vmem:[%s1574_s0 + $0x50] sm:$0xff]  ;;  %90 = vperm.xlu0 %1177, %v76_v8   ;;  %v77_v11 = vld [vmem:[%s1576_s2 + $0x18] sm:$0xff]  ;;  %v74_v12 = vld [vmem:[%s1576_s2] sm:$0xff] }
   0x4   :  { %1165 = vmatprep.subr.msk.bf16.mxu0 %vm108_vm0, %v69_v3  ;;  %v137_v7 = vsel %vm108_vm0, %v69_v3, 0  ;;  %80 = vperm.xlu1 %1178, %v74_v12   ;;  %v1179_v13 = vld [vmem:[%s1575_s1] sm:$0xff]   ;;  %v67_v15 = vpack.c.bf16 %v57_v10, %v56_v9  ;;  %v75_v16 = vld [vmem:[%s1576_s2 + $0x8] sm:$0xff]  ;;  %v208_v17 = vld [vmem:[%s1578_s4 + $0x30] sm:$0xff] }
   0x5   :  { %1066 = vmatpush3.bf16.xpose.msra.mxu0 %v137_v7  ;;  %v134_v14 = vsel %vm108_vm0, %v68_v6, 0  ;;  %1081 = vmatprep.mubr.msk.bf16.mxu0 %vm108_vm0, %v1179_v13  ;;  %v209_v18 = vld [vmem:[%s1578_s4 + $0x38] sm:$0xff]  ;;  %v54_v19 = vld [vmem:[%s1574_s0 + $0x40] sm:$0xff]  ;;  %v55_v20 = vld [vmem:[%s1574_s0 + $0x48] sm:$0xff] }
   0x6   :  { %1166 = vmatprep.subr.msk.bf16.mxu0 %vm108_vm0, %v68_v6  ;;  %v206_v21 = vld [vmem:[%s1578_s4 + $0x20] sm:$0xff]  ;;  %v66_v22 = vpack.c.bf16 %v55_v20, %v54_v19  ;;  %v207_v23 = vld [vmem:[%s1578_s4 + $0x28] sm:$0xff]  ;;  %v131_v24 = vsel %vm108_vm0, %v67_v15, 0  ;;  %v204_v25 = vld [vmem:[%s1578_s4 + $0x10] sm:$0xff] }
   0x7   :  { %95 = vperm.xlu0 %1177, %v77_v11   ;;  %v52_v27 = vld [vmem:[%s1574_s0 + $0x30] sm:$0xff]  ;;  %v53_v28 = vld [vmem:[%s1574_s0 + $0x38] sm:$0xff]  ;;  %v202_v29 = vld [vmem:[%s1578_s4] sm:$0xff] }
   0x8   :  { %85 = vperm.xlu1 %1178, %v75_v16   ;;  %v128_v26 = vsel %vm108_vm0, %v66_v22, 0  ;;  %v205_v30 = vld [vmem:[%s1578_s4 + $0x18] sm:$0xff]  ;;  %v203_v31 = vld [vmem:[%s1578_s4 + $0x8] sm:$0xff]  ;;  %v390_v32 = vld [vmem:[%s1580_s6 + $0x70] sm:$0xff]  ;;  %v65_v33 = vpack.c.bf16 %v53_v28, %v52_v27 }
   0x9   :  { %v391_v34 = vld [vmem:[%s1580_s6 + $0x78] sm:$0xff]  ;;  %v50_v35 = vld [vmem:[%s1574_s0 + $0x20] sm:$0xff]  ;;  %v51_v36 = vld [vmem:[%s1574_s0 + $0x28] sm:$0xff] }
   0xa   :  { %v388_v37 = vld [vmem:[%s1580_s6 + $0x60] sm:$0xff]  ;;  %v389_v38 = vld [vmem:[%s1580_s6 + $0x68] sm:$0xff]  ;;  %v125_v39 = vsel %vm108_vm0, %v65_v33, 0  ;;  %v64_v40 = vpack.c.bf16 %v51_v36, %v50_v35 }
   0xb   :  { %242 = vperm.xlu0 %1177, %v208_v17  }
   0xc   :  { %247 = vperm.xlu1 %1178, %v209_v18  }
   0xd   :  { %1068 = vmatpush3.bf16.xpose.msra.mxu0 %v134_v14 }
   0xe   :  { %1167 = vmatprep.subr.msk.bf16.mxu0 %vm108_vm0, %v67_v15 }
   0xf   :  { %232 = vperm.xlu0 %1177, %v206_v21  }
  0x10   :  { %237 = vperm.xlu1 %1178, %v207_v23  }
  0x13   :  { %222 = vperm.xlu0 %1177, %v204_v25  }
  0x14   :  { %227 = vperm.xlu1 %1178, %v205_v30  }
  0x15   :  { %1070 = vmatpush3.bf16.xpose.msra.mxu0 %v131_v24 }
  0x16   :  { %1168 = vmatprep.subr.msk.bf16.mxu0 %vm108_vm0, %v66_v22 }
  0x17   :  { %212 = vperm.xlu0 %1177, %v202_v29  }
  0x18   :  { %217 = vperm.xlu1 %1178, %v203_v31  }
  0x1b   :  { %464 = vperm.xlu0 %1177, %v390_v32  }
  0x1c   :  { %469 = vperm.xlu1 %1178, %v391_v34  }
  0x1d   :  { %1072 = vmatpush3.bf16.xpose.msra.mxu0 %v128_v26 }
  0x1e   :  { %1169 = vmatprep.subr.msk.bf16.mxu0 %vm108_vm0, %v65_v33 }
  0x1f   :  { %454 = vperm.xlu0 %1177, %v388_v37  }
  0x20   :  { %18 = vsyncpa [#allocation3], 0  ;;  %v386_v41 = vld [vmem:[%s1580_s6 + $0x50] sm:$0xff]  ;;  %459 = vperm.xlu1 %1178, %v389_v38   ;;  %v387_v42 = vld [vmem:[%s1580_s6 + $0x58] sm:$0xff]  ;;  %v122_v47 = vsel %vm108_vm0, %v64_v40, 0  ;;  %vm270_vm1 = vcmask 261120  }
  0x21   :  { %v48_v43 = vld [vmem:[%s1574_s0 + $0x10] sm:$0xff]  ;;  %v49_v44 = vld [vmem:[%s1574_s0 + $0x18] sm:$0xff]  ;;  %v384_v45 = vld [vmem:[%s1580_s6 + $0x40] sm:$0xff]  ;;  %vm512_vm2 = vcmask 523264   ;;  %vm1223_vm3 = vmmov 0   ;;  %s1224_s16 = smov [#allocation2]  }
  0x22   :  { %v385_v46 = vld [vmem:[%s1580_s6 + $0x48] sm:$0xff]  ;;  %v63_v48 = vpack.c.bf16 %v49_v44, %v48_v43  ;;  %v382_v49 = vld [vmem:[%s1580_s6 + $0x30] sm:$0xff]  ;;  %v383_v50 = vld [vmem:[%s1580_s6 + $0x38] sm:$0xff] }
  0x23   :  { %444 = vperm.xlu0 %1177, %v386_v41   ;;  %v46_v51 = vld [vmem:[%s1574_s0] sm:$0xff]  ;;  %v47_v52 = vld [vmem:[%s1574_s0 + $0x8] sm:$0xff]  ;;  %v378_v57 = vld [vmem:[%s1580_s6 + $0x10] sm:$0xff] }
  0x24   :  { %449 = vperm.xlu1 %1178, %v387_v42   ;;  %v380_v53 = vld [vmem:[%s1580_s6 + $0x20] sm:$0xff]  ;;  %v381_v54 = vld [vmem:[%s1580_s6 + $0x28] sm:$0xff]  ;;  %v119_v55 = vsel %vm108_vm0, %v63_v48, 0  ;;  %v62_v56 = vpack.c.bf16 %v47_v52, %v46_v51  ;;  %v379_v58 = vld [vmem:[%s1580_s6 + $0x18] sm:$0xff] }
  0x25   :  { %1074 = vmatpush3.bf16.xpose.msra.mxu0 %v125_v39  ;;  %v376_v59 = vld [vmem:[%s1580_s6] sm:$0xff]  ;;  %v377_v60 = vld [vmem:[%s1580_s6 + $0x8] sm:$0xff]  ;;  %v672_v62 = vld [vmem:[%s1582_s8 + $0x30] sm:$0xff] }
  0x26   :  { %1170 = vmatprep.subr.msk.bf16.mxu0 %vm108_vm0, %v64_v40  ;;  %v116_v61 = vsel %vm108_vm0, %v62_v56, 0  ;;  %v673_v63 = vld [vmem:[%s1582_s8 + $0x38] sm:$0xff]  ;;  %v670_v0 = vld [vmem:[%s1582_s8 + $0x20] sm:$0xff]  ;;  %v1180_v1 = vld [vmem:[%s1575_s1 + $0x8] sm:$0xff]  }
  0x27   :  { %434 = vperm.xlu0 %1177, %v384_v45   ;;  %v671_v2 = vld [vmem:[%s1582_s8 + $0x28] sm:$0xff]  ;;  %v668_v3 = vld [vmem:[%s1582_s8 + $0x10] sm:$0xff]  ;;  %v669_v4 = vld [vmem:[%s1582_s8 + $0x18] sm:$0xff] }
  0x28   :  { %439 = vperm.xlu1 %1178, %v385_v46   ;;  %v666_v5 = vld [vmem:[%s1582_s8] sm:$0xff]  ;;  %v667_v6 = vld [vmem:[%s1582_s8 + $0x8] sm:$0xff]  ;;  %v821_v7 = vld [vmem:[%s1584_s10 + $0x10] sm:$0xff] }
  0x29   :  { %v822_v8 = vld [vmem:[%s1584_s10 + $0x18] sm:$0xff]  ;;  %v819_v9 = vld [vmem:[%s1584_s10] sm:$0xff]  ;;  %v820_v10 = vld [vmem:[%s1584_s10 + $0x8] sm:$0xff] }
  0x2a   :  { %v915_v11 = vld [vmem:[%s1586_s12] sm:$0xff]  ;;  %v1182_v31 = vld [vmem:[%s1577_s3 + $0x8] sm:$0xff]   ;;  %v1183_v32 = vld [vmem:[%s1577_s3 + $0x10] sm:$0xff]  }
  0x2b   :  { %424 = vperm.xlu0 %1177, %v382_v49   ;;  %v1181_v12 = vld [vmem:[%s1577_s3] sm:$0xff]   ;;  %v1184_v33 = vld [vmem:[%s1577_s3 + $0x18] sm:$0xff]   ;;  %s971_s3 = sshll.u32 %s1224_s16, 4  ;;  %s972_s3 = int_to_ptr.vmem [resolvable:$true] %s971_s3 }
  0x2c   :  { %429 = vperm.xlu1 %1178, %v383_v50   ;;  %1089 = vmatprep.mubr.msk.bf16.mxu1 %vm270_vm1, %v1181_v12  ;;  %v1185_v34 = vld [vmem:[%s1579_s5] sm:$0xff]   ;;  %v1191_v12 = vld [vmem:[%s1579_s5 + $0x30] sm:$0xff]   ;;  %s1199_s17 = scalar_lea.vmem %s972_s3, 128  ;;  %p1204_p1 = scmp.lt.s32.totalorder %s972_s3, %s972_s3 }
  0x2d   :  { %1076 = vmatpush3.bf16.xpose.msra.mxu0 %v122_v47  ;;  %p1200_p0 = scmp.ne.s32.totalorder %s972_s3, %s1199_s17  ;;  %p1205_p2 = scmp.lt.s32.totalorder %s1199_s17, %s1199_s17 }
  0x2e   :  { %1171 = vmatprep.subr.msk.bf16.mxu0 %vm108_vm0, %v63_v48 }
  0x2f   :  { %414 = vperm.xlu0 %1177, %v380_v53   ;;  %p1206_p3 = por %p1205_p2, %p1204_p1 }
  0x30   :  { %419 = vperm.xlu1 %1178, %v381_v54  }
  0x31   :  { %p1207_p4 = pnand %p1206_p3, %p1200_p0 }
  0x33   :  { %404 = vperm.xlu0 %1177, %v378_v57  }
  0x34   :  { %409 = vperm.xlu1 %1178, %v379_v58  }
  0x35   :  { %1078 = vmatpush3.bf16.xpose.msra.mxu0 %v119_v55 }
  0x36   :  { %1172 = vmatprep.subr.msk.bf16.mxu0 %vm108_vm0, %v62_v56 }
  0x37   :  { %394 = vperm.xlu0 %1177, %v376_v59  }
  0x38   :  { %399 = vperm.xlu1 %1178, %v377_v60  }
  0x3b   :  { %706 = vperm.xlu0 %1177, %v672_v62  }
  0x3c   :  { %711 = vperm.xlu1 %1178, %v673_v63  }
  0x3d   :  { %1080 = vmatpush3.bf16.xpose.msra.mxu0 %v116_v61 }
  0x3f   :  { %696 = vperm.xlu0 %1177, %v670_v0  }
  0x40   :  { %701 = vperm.xlu1 %1178, %v671_v2  }
  0x43   :  { %686 = vperm.xlu0 %1177, %v668_v3  }
  0x44   :  { %1082 = vmatmul.mubr.msk.bf16.vlgmr.msra.gmra.mxu0 %vm108_vm0, %v1180_v1  ;;  %691 = vperm.xlu1 %1178, %v669_v4  }
  0x47   :  { %676 = vperm.xlu0 %1177, %v666_v5  }
  0x48   :  { %681 = vperm.xlu1 %1178, %v667_v6  }
  0x4b   :  { %835 = vperm.xlu0 %1177, %v821_v7   ;;  %v1186_v7 = vld [vmem:[%s1579_s5 + $0x8] sm:$0xff]  }
  0x4c   :  { %840 = vperm.xlu1 %1178, %v822_v8   ;;  %v1187_v8 = vld [vmem:[%s1579_s5 + $0x10] sm:$0xff]  }
  0x4f   :  { %825 = vperm.xlu0 %1177, %v819_v9   ;;  %v1188_v9 = vld [vmem:[%s1579_s5 + $0x18] sm:$0xff]  }
  0x50   :  { %830 = vperm.xlu1 %1178, %v820_v10   ;;  %v1189_v10 = vld [vmem:[%s1579_s5 + $0x20] sm:$0xff]  }
  0x53   :  { %918 = vperm.xlu0 %1177, %v915_v11   ;;  %v1190_v11 = vld [vmem:[%s1579_s5 + $0x28] sm:$0xff]  }
  0x7e   :  { %v91_v13 = vpop.permute.xlu0 %90 }
  0x7f   :  { %v81_v14 = vpop.permute.xlu1 %80 }
  0x82   :  { %v96_v18 = vpop.permute.xlu0 %95 }
  0x83   :  { %v86_v22 = vpop.permute.xlu1 %85 }
  0x86   :  { %v243_v37 = vpop.permute.xlu0 %242 }
  0x87   :  { %v248_v35 = vpop.permute.xlu1 %247 }
  0x8a   :  { %v233_v42 = vpop.permute.xlu0 %232 }
  0x8b   :  { %v238_v40 = vpop.permute.xlu1 %237 }
  0x8e   :  { %v223_v50 = vpop.permute.xlu0 %222 }
  0x8f   :  { %v228_v46 = vpop.permute.xlu1 %227 }
  0x92   :  { %v213_v0 = vpop.permute.xlu0 %212 }
  0x93   :  { %v218_v60 = vpop.permute.xlu1 %217 }
 0x104   :  { %v1083_v15 = vpop.f32.mrf.mxu0 }
 0x105   :  { %v182_v17 = vadd.f32 %v1083_v15, %v91_v13  ;;  %v1192_v13 = vld [vmem:[%s1579_s5 + $0x38] sm:$0xff]  }
 0x106   :  { %v173_v16 = vpop.f32.mrf.mxu0 }
 0x107   :  { %v174_v20 = vadd.f32 %v173_v16, %v81_v14  ;;  %v190_v24 = vmax.f32 %v182_v17, 0.0  ;;  %v1193_v14 = vld [vmem:[%s1581_s7] sm:$0xff]  }
 0x108   :  { %v1084_v19 = vpop.f32.mrf.mxu0 }
 0x109   :  { %v185_v21 = vadd.f32 %v1084_v19, %v96_v18  ;;  %v188_v27 = vmax.f32 %v174_v20, 0.0  ;;  %v470_v19 = vpop.permute.xlu1 %469 }
 0x10a   :  { %v176_v23 = vpop.f32.mrf.mxu0 }
 0x10b   :  { %v191_v25 = vmax.f32 %v185_v21, 0.0  ;;  %v177_v26 = vadd.f32 %v176_v23, %v86_v22  ;;  %v465_v21 = vpop.permute.xlu0 %464 }
 0x10d   :  { %v189_v28 = vmax.f32 %v177_v26, 0.0  ;;  %v193_v29 = vpack.c.bf16 %v191_v25, %v190_v24  ;;  %v460_v24 = vpop.permute.xlu1 %459 }
 0x10f   :  { %v192_v30 = vpack.c.bf16 %v189_v28, %v188_v27  ;;  %1085 = vmatprep.subr.bf16.mxu1 %v193_v29  ;;  %v455_v26 = vpop.permute.xlu0 %454 }
 0x110   :  { %1086 = vmatpush3.bf16.msra.mxu1 %v193_v29 }
 0x111   :  { %1087 = vmatprep.subr.bf16.mxu1 %v192_v30  ;;  %v450_v29 = vpop.permute.xlu1 %449 }
 0x114   :  { %1088 = vmatpush3.bf16.msra.mxu1 %v192_v30 }
 0x117   :  { %1090 = vmatmul.mubr.msk.bf16.vlgmr.msra.gmra.mxu1 %vm270_vm1, %v1182_v31  ;;  %v445_v31 = vpop.permute.xlu0 %444 }
 0x118   :  { %1093 = vmatprep.mubr.msk.bf16.mxu1 %vm270_vm1, %v1183_v32 }
 0x11f   :  { %1094 = vmatmul.mubr.msk.bf16.gmra.mxu1 %vm270_vm1, %v1184_v33 }
 0x120   :  { %1105 = vmatprep.mubr.msk.bf16.mxu1 %vm512_vm2, %v1185_v34  ;;  %v440_v34 = vpop.permute.xlu1 %439 }
 0x1d7   :  { %v1091_v36 = vpop.f32.mrf.mxu1 }
 0x1d8   :  { %v326_v56 = vadd.f32 %v1091_v36, %v223_v50 }
 0x1d9   :  { %v317_v38 = vpop.f32.mrf.mxu1 }
 0x1da   :  { %v350_v1 = vmax.f32 %v326_v56, 0.0  ;;  %v318_v2 = vadd.f32 %v317_v38, %v213_v0 }
 0x1db   :  { %v1092_v39 = vpop.f32.mrf.mxu1 }
 0x1dc   :  { %v329_v52 = vadd.f32 %v1092_v39, %v228_v46  ;;  %v348_v5 = vmax.f32 %v318_v2, 0.0  ;;  %v430_v46 = vpop.permute.xlu1 %429 }
 0x1dd   :  { %v320_v41 = vpop.f32.mrf.mxu1 }
 0x1de   :  { %v351_v61 = vmax.f32 %v329_v52, 0.0  ;;  %v321_v62 = vadd.f32 %v320_v41, %v218_v60 }
 0x1df   :  { %v1095_v43 = vpop.f32.mrf.mxu1 }
 0x1e0   :  { %v342_v45 = vadd.f32 %v1095_v43, %v243_v37  ;;  %v357_v3 = vpack.c.bf16 %v351_v61, %v350_v1  ;;  %v349_v4 = vmax.f32 %v321_v62, 0.0  ;;  %v435_v37 = vpop.permute.xlu0 %434 }
 0x1e1   :  { %v333_v44 = vpop.f32.mrf.mxu1 }
 0x1e2   :  { %v334_v48 = vadd.f32 %v333_v44, %v233_v42  ;;  %v354_v53 = vmax.f32 %v342_v45, 0.0  ;;  %v356_v6 = vpack.c.bf16 %v349_v4, %v348_v5 }
 0x1e3   :  { %v1096_v47 = vpop.f32.mrf.mxu1 }
 0x1e4   :  { %v345_v49 = vadd.f32 %v1096_v47, %v248_v35  ;;  %v352_v57 = vmax.f32 %v334_v48, 0.0 }
 0x1e5   :  { %v336_v51 = vpop.f32.mrf.mxu1 }
 0x1e6   :  { %v355_v54 = vmax.f32 %v345_v49, 0.0  ;;  %v337_v55 = vadd.f32 %v336_v51, %v238_v40  ;;  %v425_v51 = vpop.permute.xlu0 %424 }
 0x1e8   :  { %v359_v58 = vpack.c.bf16 %v355_v54, %v354_v53  ;;  %v353_v59 = vmax.f32 %v337_v55, 0.0 }
 0x1ea   :  { %v358_v63 = vpack.c.bf16 %v353_v59, %v352_v57  ;;  %1097 = vmatprep.subr.bf16.mxu1 %v359_v58  ;;  %v420_v57 = vpop.permute.xlu1 %419  ;;  %v415_v61 = vpop.permute.xlu0 %414 }
 0x1eb   :  { %1098 = vmatpush3.bf16.msra.mxu1 %v359_v58 }
 0x1ec   :  { %1099 = vmatprep.subr.bf16.mxu1 %v358_v63 }
 0x1ef   :  { %1100 = vmatpush3.bf16.msra.mxu1 %v358_v63 }
 0x1f0   :  { %1101 = vmatprep.subr.bf16.mxu1 %v357_v3 }
 0x1f3   :  { %1102 = vmatpush3.bf16.msra.mxu1 %v357_v3  ;;  %v410_v3 = vpop.permute.xlu1 %409 }
 0x1f4   :  { %1103 = vmatprep.subr.bf16.mxu1 %v356_v6 }
 0x1f7   :  { %1104 = vmatpush3.bf16.msra.mxu1 %v356_v6  ;;  %v405_v6 = vpop.permute.xlu0 %404 }
 0x1fa   :  { %1106 = vmatmul.mubr.msk.bf16.vlgmr.msra.gmra.mxu1 %vm512_vm2, %v1186_v7 }
 0x1fb   :  { %1109 = vmatprep.mubr.msk.bf16.mxu1 %vm512_vm2, %v1187_v8 }
 0x202   :  { %1110 = vmatmul.mubr.msk.bf16.gmra.mxu1 %vm512_vm2, %v1188_v9 }
 0x203   :  { %1113 = vmatprep.mubr.msk.bf16.mxu1 %vm512_vm2, %v1189_v10 }
 0x20a   :  { %1114 = vmatmul.mubr.msk.bf16.gmra.mxu1 %vm512_vm2, %v1190_v11 }
 0x20b   :  { %1117 = vmatprep.mubr.msk.bf16.mxu1 %vm512_vm2, %v1191_v12  ;;  %v400_v12 = vpop.permute.xlu1 %399 }
 0x212   :  { %1118 = vmatmul.mubr.msk.bf16.gmra.mxu1 %vm512_vm2, %v1192_v13 }
 0x213   :  { %1137 = vmatprep.mubr.bf16.mxu1 %v1193_v14 }
 0x2ba   :  { %v1541_v15 = vpop.f32.mrf.mxu1 }
 0x2bb   :  { %v580_v10 = vadd.f32 %v1541_v15, %v405_v6  ;;  %v1194_v15 = vld [vmem:[%s1581_s7 + $0x8] sm:$0xff]  }
 0x2bc   :  { %v1543_v16 = vpop.f32.mrf.mxu1 }
 0x2be   :  { %v1108_v17 = vpop.f32.mrf.mxu1 }
 0x2bf   :  { %v583_v7 = vadd.f32 %v1108_v17, %v410_v3 }
 0x2c0   :  { %v1545_v18 = vpop.f32.mrf.mxu1 }
 0x2c1   :  { %v637_v13 = vmax.f32 %v583_v7, 0.0  ;;  %v575_v14 = vadd.f32 %v1545_v18, %v400_v12  ;;  %v1195_v18 = vld [vmem:[%s1581_s7 + $0x10] sm:$0xff]  }
 0x2c2   :  { %v1111_v20 = vpop.f32.mrf.mxu1 }
 0x2c3   :  { %v596_v62 = vadd.f32 %v1111_v20, %v425_v51  ;;  %v395_v20 = vpop.permute.xlu0 %394  ;;  %v635_v17 = vmax.f32 %v575_v14, 0.0 }
 0x2c4   :  { %v587_v22 = vpop.f32.mrf.mxu1 }
 0x2c5   :  { %v640_v4 = vmax.f32 %v596_v62, 0.0  ;;  %v588_v5 = vadd.f32 %v587_v22, %v415_v61  ;;  %v572_v22 = vadd.f32 %v1543_v16, %v395_v20  ;;  %v1196_v16 = vld [vmem:[%s1581_s7 + $0x18] sm:$0xff]  }
 0x2c6   :  { %v1112_v23 = vpop.f32.mrf.mxu1 }
 0x2c7   :  { %v599_v58 = vadd.f32 %v1112_v23, %v430_v46  ;;  %v638_v11 = vmax.f32 %v588_v5, 0.0 }
 0x2c8   :  { %v590_v25 = vpop.f32.mrf.mxu1 }
 0x2c9   :  { %v641_v0 = vmax.f32 %v599_v58, 0.0  ;;  %v591_v1 = vadd.f32 %v590_v25, %v420_v57 }
 0x2ca   :  { %v1115_v27 = vpop.f32.mrf.mxu1 }
 0x2cb   :  { %v612_v47 = vadd.f32 %v1115_v27, %v445_v31  ;;  %v653_v8 = vpack.c.bf16 %v641_v0, %v640_v4  ;;  %v639_v9 = vmax.f32 %v591_v1, 0.0  ;;  %v712_v27 = vpop.permute.xlu1 %711  ;;  %v1222_v0 = vmov 0.0  }
 0x2cc   :  { %v603_v28 = vpop.f32.mrf.mxu1  ;;  %1157 = vmatprep.subr.bf16.mxu0 %v1222_v0  ;;  %1161 = vmatprep.mubr.msk.bf16.mxu0 %vm1223_vm3, %v1222_v0 }
 0x2cd   :  { %v644_v55 = vmax.f32 %v612_v47, 0.0  ;;  %v604_v56 = vadd.f32 %v603_v28, %v435_v37 }
 0x2ce   :  { %v1116_v30 = vpop.f32.mrf.mxu1 }
 0x2cf   :  { %v615_v42 = vadd.f32 %v1116_v30, %v450_v29  ;;  %v642_v63 = vmax.f32 %v604_v56, 0.0  ;;  %v707_v29 = vpop.permute.xlu0 %706 }
 0x2d0   :  { %v606_v32 = vpop.f32.mrf.mxu1 }
 0x2d1   :  { %v645_v52 = vmax.f32 %v615_v42, 0.0  ;;  %v607_v53 = vadd.f32 %v606_v32, %v440_v34  ;;  %v702_v32 = vpop.permute.xlu1 %701 }
 0x2d2   :  { %v1119_v33 = vpop.f32.mrf.mxu1 }
 0x2d3   :  { %v628_v36 = vadd.f32 %v1119_v33, %v465_v21  ;;  %v655_v59 = vpack.c.bf16 %v645_v52, %v644_v55  ;;  %v643_v60 = vmax.f32 %v607_v53, 0.0  ;;  %v636_v21 = vmax.f32 %v580_v10, 0.0  ;;  %v697_v34 = vpop.permute.xlu0 %696 }
 0x2d4   :  { %v619_v35 = vpop.f32.mrf.mxu1 }
 0x2d5   :  { %v620_v39 = vadd.f32 %v619_v35, %v455_v26  ;;  %v648_v43 = vmax.f32 %v628_v36, 0.0  ;;  %v654_v2 = vpack.c.bf16 %v643_v60, %v642_v63  ;;  %v651_v23 = vpack.c.bf16 %v637_v13, %v636_v21  ;;  %v1197_v26 = vld [vmem:[%s1583_s9] sm:$0xff]   ;;  %v1198_v63 = vld [vmem:[%s1583_s9 + $0x8] sm:$0xff]  }
 0x2d6   :  { %v1120_v38 = vpop.f32.mrf.mxu1 }
 0x2d7   :  { %v631_v40 = vadd.f32 %v1120_v38, %v470_v19  ;;  %v646_v48 = vmax.f32 %v620_v39, 0.0  ;;  %v652_v19 = vpack.c.bf16 %v639_v9, %v638_v11  ;;  %v692_v38 = vpop.permute.xlu1 %691  ;;  %v687_v42 = vpop.permute.xlu0 %686 }
 0x2d8   :  { %v622_v41 = vpop.f32.mrf.mxu1 }
 0x2d9   :  { %v649_v44 = vmax.f32 %v631_v40, 0.0  ;;  %v623_v45 = vadd.f32 %v622_v41, %v460_v24  ;;  %v634_v24 = vmax.f32 %v572_v22, 0.0 }
 0x2db   :  { %v657_v49 = vpack.c.bf16 %v649_v44, %v648_v43  ;;  %v647_v50 = vmax.f32 %v623_v45, 0.0  ;;  %v650_v25 = vpack.c.bf16 %v635_v17, %v634_v24  ;;  %v682_v52 = vpop.permute.xlu1 %681  ;;  %v677_v56 = vpop.permute.xlu0 %676 }
 0x2dd   :  { %v656_v54 = vpack.c.bf16 %v647_v50, %v646_v48  ;;  %1121 = vmatprep.subr.bf16.mxu1 %v657_v49 }
 0x2de   :  { %1122 = vmatpush3.bf16.msra.mxu1 %v657_v49 }
 0x2df   :  { %1123 = vmatprep.subr.bf16.mxu1 %v656_v54  ;;  %v836_v1 = vpop.permute.xlu0 %835 }
 0x2e2   :  { %1124 = vmatpush3.bf16.msra.mxu1 %v656_v54 }
 0x2e3   :  { %1125 = vmatprep.subr.bf16.mxu1 %v655_v59  ;;  %v826_v7 = vpop.permute.xlu0 %825 }
 0x2e6   :  { %1126 = vmatpush3.bf16.msra.mxu1 %v655_v59 }
 0x2e7   :  { %1127 = vmatprep.subr.bf16.mxu1 %v654_v2  ;;  %v919_v17 = vpop.permute.xlu0 %918 }
 0x2ea   :  { %1128 = vmatpush3.bf16.msra.mxu1 %v654_v2  ;;  %v841_v2 = vpop.permute.xlu1 %840 }
 0x2eb   :  { %1129 = vmatprep.subr.bf16.mxu1 %v653_v8 }
 0x2ee   :  { %1130 = vmatpush3.bf16.msra.mxu1 %v653_v8  ;;  %v831_v9 = vpop.permute.xlu1 %830 }
 0x2ef   :  { %1131 = vmatprep.subr.bf16.mxu1 %v652_v19 }
 0x2f2   :  { %1132 = vmatpush3.bf16.msra.mxu1 %v652_v19 }
 0x2f3   :  { %1133 = vmatprep.subr.bf16.mxu1 %v651_v23 }
 0x2f6   :  { %1134 = vmatpush3.bf16.msra.mxu1 %v651_v23  ;;  %v914_v23 = vld [vmem:[%s1585_s11] sm:$0xf] }
 0x2f7   :  { %1135 = vmatprep.subr.bf16.mxu1 %v650_v25 }
 0x2fa   :  { %1136 = vmatpush3.bf16.msra.mxu1 %v650_v25 }
 0x2fd   :  { %1138 = vmatmul.mubr.bf16.vlgmr.msra.gmra.mxu1 %v1194_v15 }
 0x2fe   :  { %1141 = vmatprep.mubr.bf16.mxu1 %v1195_v18 }
 0x305   :  { %1142 = vmatmul.mubr.bf16.gmra.mxu1 %v1196_v16 }
 0x306   :  { %1153 = vmatprep.mubr.msk.bf16.mxu1 %vm512_vm2, %v1197_v26 }
 0x3bd   :  { %v1139_v28 = vpop.f32.mrf.mxu1 }
 0x3be   :  { %v781_v48 = vadd.f32 %v1139_v28, %v687_v42 }
 0x3bf   :  { %v772_v30 = vpop.f32.mrf.mxu1 }
 0x3c0   :  { %v805_v57 = vmax.f32 %v781_v48, 0.0  ;;  %v773_v58 = vadd.f32 %v772_v30, %v677_v56 }
 0x3c1   :  { %v1140_v31 = vpop.f32.mrf.mxu1 }
 0x3c2   :  { %v784_v44 = vadd.f32 %v1140_v31, %v692_v38  ;;  %v803_v61 = vmax.f32 %v773_v58, 0.0 }
 0x3c3   :  { %v775_v33 = vpop.f32.mrf.mxu1 }
 0x3c4   :  { %v806_v53 = vmax.f32 %v784_v44, 0.0  ;;  %v776_v54 = vadd.f32 %v775_v33, %v682_v52 }
 0x3c5   :  { %v1143_v35 = vpop.f32.mrf.mxu1 }
 0x3c6   :  { %v797_v37 = vadd.f32 %v1143_v35, %v707_v29  ;;  %v812_v59 = vpack.c.bf16 %v806_v53, %v805_v57  ;;  %v804_v60 = vmax.f32 %v776_v54, 0.0 }
 0x3c7   :  { %v788_v36 = vpop.f32.mrf.mxu1 }
 0x3c8   :  { %v789_v40 = vadd.f32 %v788_v36, %v697_v34  ;;  %v809_v45 = vmax.f32 %v797_v37, 0.0  ;;  %v811_v62 = vpack.c.bf16 %v804_v60, %v803_v61 }
 0x3c9   :  { %v1144_v39 = vpop.f32.mrf.mxu1 }
 0x3ca   :  { %v800_v41 = vadd.f32 %v1144_v39, %v712_v27  ;;  %v807_v49 = vmax.f32 %v789_v40, 0.0 }
 0x3cb   :  { %v791_v43 = vpop.f32.mrf.mxu1 }
 0x3cc   :  { %v810_v46 = vmax.f32 %v800_v41, 0.0  ;;  %v792_v47 = vadd.f32 %v791_v43, %v702_v32 }
 0x3ce   :  { %v814_v50 = vpack.c.bf16 %v810_v46, %v809_v45  ;;  %v808_v51 = vmax.f32 %v792_v47, 0.0 }
 0x3d0   :  { %v813_v55 = vpack.c.bf16 %v808_v51, %v807_v49  ;;  %1145 = vmatprep.subr.bf16.mxu1 %v814_v50 }
 0x3d1   :  { %1146 = vmatpush3.bf16.msra.mxu1 %v814_v50 }
 0x3d2   :  { %1147 = vmatprep.subr.bf16.mxu1 %v813_v55 }
 0x3d5   :  { %1148 = vmatpush3.bf16.msra.mxu1 %v813_v55 }
 0x3d6   :  { %1149 = vmatprep.subr.bf16.mxu1 %v812_v59 }
 0x3d9   :  { %1150 = vmatpush3.bf16.msra.mxu1 %v812_v59 }
 0x3da   :  { %1151 = vmatprep.subr.bf16.mxu1 %v811_v62 }
 0x3dd   :  { %1152 = vmatpush3.bf16.msra.mxu1 %v811_v62 }
 0x3e0   :  { %1154 = vmatmul.mubr.msk.bf16.vlgmr.msra.gmra.mxu1 %vm512_vm2, %v1198_v63 }
 0x4a0   :  { %v1155_v3 = vpop.f32.mrf.mxu1 }
 0x4a1   :  { %v902_v5 = vadd.f32 %v1155_v3, %v836_v1 }
 0x4a2   :  { %v893_v4 = vpop.f32.mrf.mxu1 }
 0x4a3   :  { %v910_v11 = vmax.f32 %v902_v5, 0.0  ;;  %v894_v12 = vadd.f32 %v893_v4, %v826_v7 }
 0x4a4   :  { %v1156_v6 = vpop.f32.mrf.mxu1 }
 0x4a5   :  { %v905_v8 = vadd.f32 %v1156_v6, %v841_v2  ;;  %v908_v21 = vmax.f32 %v894_v12, 0.0 }
 0x4a6   :  { %v896_v10 = vpop.f32.mrf.mxu1 }
 0x4a7   :  { %v911_v13 = vmax.f32 %v905_v8, 0.0  ;;  %v897_v14 = vadd.f32 %v896_v10, %v831_v9 }
 0x4a9   :  { %v913_v19 = vpack.c.bf16 %v911_v13, %v910_v11  ;;  %v909_v20 = vmax.f32 %v897_v14, 0.0 }
 0x4ab   :  { %1158 = vmatpush3.bf16.msra.mxu0 %v913_v19  ;;  %v912_v22 = vpack.c.bf16 %v909_v20, %v908_v21 }
 0x4ac   :  { %1159 = vmatprep.subr.bf16.mxu0 %v1222_v0 }
 0x4af   :  { %1160 = vmatpush3.bf16.msra.mxu0 %v912_v22 }
 0x4b2   :  { %1162 = vmatmul.mubr.msk.bf16.vlgmr.msra.gmra.mxu0 %vm270_vm1, %v914_v23 }
 0x572   :  { %v958_v24 = vpop.f32.mrf.mxu0 }
 0x573   :  { %v959_v25 = vadd.f32 %v958_v24, %v919_v17 }
 0x574   :  { %v1163_v15 = vpop.f32.mrf.mxu0 }
 0x575   :  { %964 = vst [vmem:[#allocation2] sm:$0xff] %v959_v25 }
 0x576   :  { %v961_v18 = vpop.f32.mrf.mxu0 }
 0x577   :  { %1210 = shalt.err (!%p1207_p4)
}
 0x578   :  { %974 = dma.vmem_to_hbm [thread:$0]  %s972_s3, 128, %s1587_s13, [#allocation3]   ;;  %v1164_v16 = vpop.f32.mrf.mxu0 }
 0x579   :  { %1219 = dma.done.wait [#allocation3], 128  }
 0x57a   :  { %1220 = vsyncadd [#allocation3], 4294967168 }
 0x57b   :  { %978 = vsyncpa [#allocation3], 1 }

</bundles_post_ra>
